<compile_context>
chip_gen: v5e
topology: v5e:2x2
jax: 0.10.0
libtpu: 0.0.40
codegen_flags: <defaults>
</compile_context>

<pallas_src>
import jax
import jax.numpy as jnp
from jax.experimental import pallas as pl
from jax.experimental.pallas import tpu as pltpu


def _round_up(n, m):
    return ((n + m - 1) // m) * m


def _qnet_kernel(x_ref, w1_ref, b1_ref, w2_ref, b2_ref, o_ref):
    # layer 1: x @ W1 + b1, ReLU  (MXU matmul, f32 accumulation)
    h = jnp.dot(x_ref[...], w1_ref[...], preferred_element_type=jnp.float32)
    h = jnp.maximum(h + b1_ref[...], 0.0)
    # layer 2: h @ W2 + b2  (W2/b2 lane-padded to 128 output cols; pad cols are zero)
    out = jnp.dot(h.astype(w2_ref.dtype), w2_ref[...],
                  preferred_element_type=jnp.float32)
    o_ref[...] = (out + b2_ref[...]).astype(o_ref.dtype)


def prepare_params(w1, b1, w2, b2):
    """One-time weight preprocessing. Call ONCE (not per forward pass).

    w1: [input_size, hidden_size]   (transposed PyTorch linear1.weight)
    b1: [hidden_size]
    w2: [hidden_size, output_size]  (transposed PyTorch linear2.weight)
    b2: [output_size]
    Returns (w1, b1_2d, w2_padded, b2_padded, output_size) with the output feature
    dim zero-padded to a lane-dense multiple of 128.
    """
    hidden = w1.shape[1]
    out_size = w2.shape[1]
    out_pad = max(_round_up(out_size, 128), 128)
    b1_2d = b1.reshape(1, hidden)
    w2_p = jnp.zeros((hidden, out_pad), w2.dtype).at[:, :out_size].set(w2)
    b2_p = jnp.zeros((1, out_pad), b2.dtype).at[0, :out_size].set(b2)
    return w1, b1_2d, w2_p, b2_p, out_size


def _choose_block_b(B):
    # Small/medium batches: one grid step. v5e/v6e have a single TensorCore, so a
    # multi-step grid is just a serial loop paying ~0.35us/step + fill/drain, and on
    # v7x splitting tiny batches duplicates the resident W1/W2/b DMAs per core.
    if B <= 512:
        return _round_up(max(B, 8), 8)
    # Large batches: an even number of independent "parallel" tiles (<= 2048 rows
    # each) so v7x can shard them evenly across its two TensorCores. Double-buffered
    # x/out tiles are ~2.2 MiB worst case: far under every generation's VMEM.
    n_tiles = max(2, -(-B // 2048))
    if n_tiles % 2:
        n_tiles += 1
    return _round_up(-(-B // n_tiles), 8)


def linear_qnet_forward(x, w1, b1_2d, w2_p, b2_p, out_size, *, block_b=None):
    """Forward pass of Linear_QNet with pre-prepared params (see prepare_params).

    x: [B, input_size]  ->  returns [B, out_size]
    """
    B, in_size = x.shape
    hidden = w1.shape[1]
    out_pad = w2_p.shape[1]
    dtype = x.dtype

    if block_b is None:
        block_b = _choose_block_b(B)
    assert block_b % 8 == 0

    grid = (pl.cdiv(B, block_b),)

    out_padded = pl.pallas_call(
        _qnet_kernel,
        out_shape=jax.ShapeDtypeStruct((B, out_pad), dtype),
        grid_spec=pltpu.PrefetchScalarGridSpec(
            num_scalar_prefetch=0,
            grid=grid,
            in_specs=[
                # x tile: last dim (in_size) equals the full array dim -> (8,128) rule OK;
                # ragged last batch tile is padded/masked by Pallas.
                pl.BlockSpec((block_b, in_size), lambda i: (i, 0)),
                # Weights/biases: constant index_maps -> fetched once, stay resident.
                pl.BlockSpec((in_size, hidden), lambda i: (0, 0)),   # W1
                pl.BlockSpec((1, hidden), lambda i: (0, 0)),         # b1
                pl.BlockSpec((hidden, out_pad), lambda i: (0, 0)),   # W2 (lane-padded)
                pl.BlockSpec((1, out_pad), lambda i: (0, 0)),        # b2 (lane-padded)
            ],
            out_specs=pl.BlockSpec((block_b, out_pad), lambda i: (i, 0)),
        ),
        compiler_params=pltpu.CompilerParams(
            dimension_semantics=("parallel",),      # batch tiles are independent
            vmem_limit_bytes=32 * 1024 * 1024,      # few MiB actually used; safe on v5e/v6e/v7x
        ),
    )(x, w1, b1_2d, w2_p, b2_p)

    # Only the lane padding on the output features needs stripping (B is exact).
    return out_padded[:, :out_size]


def init_params(key, input_size, hidden_size, output_size, dtype=jnp.float32):
    """Deterministic PyTorch-style init: U(-1/sqrt(fan_in), 1/sqrt(fan_in))."""
    k1, k2, k3, k4 = jax.random.split(key, 4)
    bound1 = 1.0 / (input_size ** 0.5)
    bound2 = 1.0 / (hidden_size ** 0.5)
    # stored already transposed to [in, out]
    w1 = jax.random.uniform(k1, (input_size, hidden_size), dtype, -bound1, bound1)
    b1 = jax.random.uniform(k2, (hidden_size,), dtype, -bound1, bound1)
    w2 = jax.random.uniform(k3, (hidden_size, output_size), dtype, -bound2, bound2)
    b2 = jax.random.uniform(k4, (output_size,), dtype, -bound2, bound2)
    return w1, b1, w2, b2


def reference_forward(x, w1, b1, w2, b2):
    h = jnp.maximum(x @ w1 + b1, 0.0)
    return h @ w2 + b2


# TODO(synk): model_file save()/load() are host-side torch file I/O with no Pallas
# equivalent; only the forward pass is implemented here.

if __name__ == "__main__":
    # Snake-game Q-net shapes: input=11, hidden=128, output=3.
    # B=250 is deliberately ragged (exercises the masked last/only tile).
    B, INPUT, HIDDEN, OUTPUT = 250, 11, 128, 3

    key = jax.random.PRNGKey(0)
    kx, kp = jax.random.split(key)
    x = jax.random.normal(kx, (B, INPUT), jnp.float32)
    w1, b1, w2, b2 = init_params(kp, INPUT, HIDDEN, OUTPUT)

    # One-time weight preprocessing (hoisted out of the per-call path).
    pw1, pb1, pw2, pb2, out_size = prepare_params(w1, b1, w2, b2)

    out = linear_qnet_forward(x, pw1, pb1, pw2, pb2, out_size)
    out = jax.block_until_ready(out)

    ref = reference_forward(x, w1, b1, w2, b2)
    assert out.shape == (B, OUTPUT)
    assert jnp.allclose(out, ref, atol=1e-5, rtol=1e-5), "mismatch vs reference"

    # Tiny-batch path (B=1 action selection; single partial tile of 8 rows).
    out_one = jax.block_until_ready(
        linear_qnet_forward(x[:1], pw1, pb1, pw2, pb2, out_size))
    assert jnp.allclose(out_one, ref[:1], atol=1e-5, rtol=1e-5), "B=1 mismatch"

    # Large-batch path (multi-step parallel grid for v7x dual-TC sharding).
    xb = jax.random.normal(kx, (1030, INPUT), jnp.float32)
    out_big = jax.block_until_ready(
        linear_qnet_forward(xb, pw1, pb1, pw2, pb2, out_size))
    ref_big = reference_forward(xb, w1, b1, w2, b2)
    assert jnp.allclose(out_big, ref_big, atol=1e-5, rtol=1e-5), "large-batch mismatch"

    print("KERNEL_OK")
</pallas_src>

<mosaic_0001>
module attributes {stable_mosaic.version = 11 : i64} {
  func.func @_qnet_kernel(%arg0: i32, %arg1: memref<256x11xf32, #tpu.memory_space<vmem>>, %arg2: memref<11x128xf32, #tpu.memory_space<vmem>>, %arg3: memref<1x128xf32, #tpu.memory_space<vmem>>, %arg4: memref<128x128xf32, #tpu.memory_space<vmem>>, %arg5: memref<1x128xf32, #tpu.memory_space<vmem>>, %arg6: memref<256x128xf32, #tpu.memory_space<vmem>>) attributes {dimension_semantics = [#tpu.dimension_semantics<parallel>], iteration_bounds = array<i64: 1>, scalar_prefetch = 0 : i64, scratch_operands = 0 : i64, tpu.core_type = #tpu.core_type<tc>, window_params = [{transform_indices = @transform_0, window_bounds = array<i64: 256, 11>}, {pipeline_mode = #tpu.pipeline_mode<synchronous>, transform_indices = @transform_1, window_bounds = array<i64: 11, 128>}, {pipeline_mode = #tpu.pipeline_mode<synchronous>, transform_indices = @transform_2, window_bounds = array<i64: 1, 128>}, {pipeline_mode = #tpu.pipeline_mode<synchronous>, transform_indices = @transform_3, window_bounds = array<i64: 128, 128>}, {pipeline_mode = #tpu.pipeline_mode<synchronous>, transform_indices = @transform_4, window_bounds = array<i64: 1, 128>}, {transform_indices = @transform_5, window_bounds = array<i64: 256, 128>}]} {
    %c0 = arith.constant 0 : index
    %c0_0 = arith.constant 0 : index
    %0 = vector.load %arg1[%c0, %c0_0] : memref<256x11xf32, #tpu.memory_space<vmem>>, vector<256x11xf32>
    %c0_1 = arith.constant 0 : index
    %c0_2 = arith.constant 0 : index
    %1 = vector.load %arg2[%c0_1, %c0_2] : memref<11x128xf32, #tpu.memory_space<vmem>>, vector<11x128xf32>
    %cst = arith.constant dense<0.000000e+00> : vector<256x128xf32>
    %2 = tpu.matmul %0, %1, %cst {dimension_numbers = #tpu.dot_dimension_numbers<[1], [0], [0], [1], [0, 0, 1, 1], [], []>} : vector<256x11xf32>, vector<11x128xf32>, vector<256x128xf32> -> vector<256x128xf32>
    %c0_3 = arith.constant 0 : index
    %c0_4 = arith.constant 0 : index
    %3 = vector.load %arg3[%c0_3, %c0_4] : memref<1x128xf32, #tpu.memory_space<vmem>>, vector<1x128xf32>
    %4 = vector.broadcast %3 : vector<1x128xf32> to vector<256x128xf32>
    %5 = arith.addf %2, %4 : vector<256x128xf32>
    %cst_5 = arith.constant 0.000000e+00 : f32
    %6 = vector.broadcast %cst_5 : f32 to vector<256x128xf32>
    %7 = arith.maximumf %5, %6 : vector<256x128xf32>
    %c0_6 = arith.constant 0 : index
    %c0_7 = arith.constant 0 : index
    %8 = vector.load %arg4[%c0_6, %c0_7] : memref<128x128xf32, #tpu.memory_space<vmem>>, vector<128x128xf32>
    %cst_8 = arith.constant dense<0.000000e+00> : vector<256x128xf32>
    %9 = tpu.matmul %7, %8, %cst_8 {dimension_numbers = #tpu.dot_dimension_numbers<[1], [0], [0], [1], [0, 0, 1, 1], [], []>} : vector<256x128xf32>, vector<128x128xf32>, vector<256x128xf32> -> vector<256x128xf32>
    %c0_9 = arith.constant 0 : index
    %c0_10 = arith.constant 0 : index
    %10 = vector.load %arg5[%c0_9, %c0_10] : memref<1x128xf32, #tpu.memory_space<vmem>>, vector<1x128xf32>
    %11 = vector.broadcast %10 : vector<1x128xf32> to vector<256x128xf32>
    %12 = arith.addf %9, %11 : vector<256x128xf32>
    %c0_11 = arith.constant 0 : index
    %c0_12 = arith.constant 0 : index
    %13 = vector.load %arg6[%c0_11, %c0_12] : memref<256x128xf32, #tpu.memory_space<vmem>>, vector<256x128xf32>
    tpu.vector_store %arg6[%c0_11, %c0_12], %12 {strides = array<i32>} : memref<256x128xf32, #tpu.memory_space<vmem>>, vector<256x128xf32>,
    return
  }
  func.func @transform_0(%arg0: i32) -> (i32, i32) {
    %c0_i32 = arith.constant 0 : i32
    %c0_i32_0 = arith.constant 0 : i32
    return %arg0, %c0_i32 : i32, i32
  }
  func.func @transform_1(%arg0: i32) -> (i32, i32) {
    %c0_i32 = arith.constant 0 : i32
    %c0_i32_0 = arith.constant 0 : i32
    %c0_i32_1 = arith.constant 0 : i32
    return %c0_i32, %c0_i32_0 : i32, i32
  }
  func.func @transform_2(%arg0: i32) -> (i32, i32) {
    %c0_i32 = arith.constant 0 : i32
    %c0_i32_0 = arith.constant 0 : i32
    %c0_i32_1 = arith.constant 0 : i32
    return %c0_i32, %c0_i32_0 : i32, i32
  }
  func.func @transform_3(%arg0: i32) -> (i32, i32) {
    %c0_i32 = arith.constant 0 : i32
    %c0_i32_0 = arith.constant 0 : i32
    %c0_i32_1 = arith.constant 0 : i32
    return %c0_i32, %c0_i32_0 : i32, i32
  }
  func.func @transform_4(%arg0: i32) -> (i32, i32) {
    %c0_i32 = arith.constant 0 : i32
    %c0_i32_0 = arith.constant 0 : i32
    %c0_i32_1 = arith.constant 0 : i32
    return %c0_i32, %c0_i32_0 : i32, i32
  }
  func.func @transform_5(%arg0: i32) -> (i32, i32) {
    %c0_i32 = arith.constant 0 : i32
    %c0_i32_0 = arith.constant 0 : i32
    return %arg0, %c0_i32 : i32, i32
  }
}

</mosaic_0001>

<bundles_post_ra>
// kernel: tpu_custom_call.1
= control target key start
LH: loop header
LB: loop body
LE: loop exit
PB: predicated region body
PF: predicated region fallthrough
CT: control target
= control target key end

     0   :  { %vm156_vm0 = vcmask 1042432   ;;  %vm59_vm1 = vcmask 89088   ;;  %s878_s0 = inlined_call_operand.vmem [shape: f32[250,11], index: 0, kind: input, shape index: {}]   ;;  %s879_s1 = inlined_call_operand.vmem [shape: f32[11,128], index: 1, kind: input, shape index: {}]   ;;  %s880_s2 = inlined_call_operand.vmem [shape: f32[1,128], index: 2, kind: input, shape index: {}]   ;;  %s881_s3 = inlined_call_operand.vmem [shape: f32[128,128], index: 3, kind: input, shape index: {}]   ;;  %s882_s4 = inlined_call_operand.vmem [shape: f32[1,128], index: 4, kind: input, shape index: {}]   ;;  %s883_s5 = inlined_call_operand.hbm [shape: f32[250,128], index: 5, kind: output, shape index: {}]  }
   0x1   :  { %v54_v0 = vld [vmem:[%s879_s1 + $0x8] sm:$0x7]  ;;  %v53_v1 = vld [vmem:[%s879_s1] sm:$0xff] }
   0x2   :  { %488 = vmatpush.msk.msra.mxu0 %vm156_vm0, %v54_v0  ;;  %v21_v2 = vld [vmem:[%s878_s0] sm:$0xff]  ;;  %521 = vmatpush.msk.msra.mxu3 %vm156_vm0, %v54_v0 }
   0x4   :  { %175 = vmatpush.msra.mxu0 %v53_v1  ;;  %522 = vmatpush.msra.mxu3 %v53_v1 }
   0x5   :  { %10 = vsyncpa [#allocation3], 0  ;;  %489 = vmatmul.msk.f32.vlgmr.msra.gmra.mxu0 %vm59_vm1, %v21_v2  ;;  %v22_v3 = vld [vmem:[%s878_s0 + $0x8] sm:$0xff]  ;;  %v23_v4 = vld [vmem:[%s878_s0 + $0x10] sm:$0xff]  ;;  %s476_s17 = sshll.u32 %s883_s5, 4  ;;  %s587_s18 = smov 128   ;;  %s477_s17 = int_to_ptr.hbm [resolvable:$true] %s476_s17 }
   0x6   :  { %v24_v5 = vld [vmem:[%s878_s0 + $0x18] sm:$0xff]  ;;  %v25_v6 = vld [vmem:[%s878_s0 + $0x20] sm:$0xff]  ;;  %v26_v7 = vld [vmem:[%s878_s0 + $0x28] sm:$0xff]  ;;  %s588_s19 = smov 8  }
   0x7   :  { %v27_v8 = vld [vmem:[%s878_s0 + $0x30] sm:$0xff]  ;;  %v28_v9 = vld [vmem:[%s878_s0 + $0x38] sm:$0xff]  ;;  %v29_v10 = vld [vmem:[%s878_s0 + $0x40] sm:$0xff] }
   0x8   :  { %v320_v11 = vld [vmem:[%s881_s3 + $0x78] sm:$0xff]  ;;  %v319_v12 = vld [vmem:[%s881_s3 + $0x70] sm:$0xff]  ;;  %v318_v13 = vld [vmem:[%s881_s3 + $0x68] sm:$0xff] }
   0x9   :  { %325 = vmatpush.msra.mxu1 %v320_v11  ;;  %523 = vmatpush.msra.mxu2 %v320_v11  ;;  %v30_v14 = vld [vmem:[%s878_s0 + $0x48] sm:$0xff]  ;;  %v317_v15 = vld [vmem:[%s881_s3 + $0x60] sm:$0xff]  ;;  %v316_v16 = vld [vmem:[%s881_s3 + $0x58] sm:$0xff] }
   0xa   :  { %524 = vmatpush.msrb.mxu3 %v320_v11  ;;  %v315_v17 = vld [vmem:[%s881_s3 + $0x50] sm:$0xff]  ;;  %v314_v18 = vld [vmem:[%s881_s3 + $0x48] sm:$0xff]  ;;  %v313_v20 = vld [vmem:[%s881_s3 + $0x40] sm:$0xff] }
   0xb   :  { %326 = vmatpush.msra.mxu1 %v319_v12  ;;  %525 = vmatpush.msra.mxu2 %v319_v12  ;;  %v31_v19 = vld [vmem:[%s878_s0 + $0x50] sm:$0xff]  ;;  %v312_v21 = vld [vmem:[%s881_s3 + $0x38] sm:$0xff]  ;;  %v310_v23 = vld [vmem:[%s881_s3 + $0x28] sm:$0xff] }
   0xc   :  { %526 = vmatpush.msrb.mxu3 %v319_v12  ;;  %v311_v22 = vld [vmem:[%s881_s3 + $0x30] sm:$0xff]  ;;  %v32_v24 = vld [vmem:[%s878_s0 + $0x58] sm:$0xff]  ;;  %v309_v25 = vld [vmem:[%s881_s3 + $0x20] sm:$0xff] }
   0xd   :  { %490 = vmatmul.msk.f32.gmra.mxu0 %vm59_vm1, %v22_v3  ;;  %327 = vmatpush.msra.mxu1 %v318_v13  ;;  %v39_v26 = vld [vmem:[%s878_s0 + $0x90] sm:$0xff]  ;;  %v308_v27 = vld [vmem:[%s881_s3 + $0x18] sm:$0xff]  ;;  %v33_v29 = vld [vmem:[%s878_s0 + $0x60] sm:$0xff] }
   0xe   :  { %527 = vmatpush.msra.mxu2 %v318_v13  ;;  %528 = vmatpush.msrb.mxu3 %v318_v13  ;;  %v307_v28 = vld [vmem:[%s881_s3 + $0x10] sm:$0xff]  ;;  %v306_v30 = vld [vmem:[%s881_s3 + $0x8] sm:$0xff]  ;;  %v305_v31 = vld [vmem:[%s881_s3] sm:$0xff] }
   0xf   :  { %328 = vmatpush.msra.mxu1 %v317_v15  ;;  %507 = vmatmul.msk.f32.vlgmr.msra.gmra.mxu3 %vm59_vm1, %v39_v26  ;;  %v40_v32 = vld [vmem:[%s878_s0 + $0x98] sm:$0xff]  ;;  %v34_v33 = vld [vmem:[%s878_s0 + $0x68] sm:$0xff]  ;;  %v41_v34 = vld [vmem:[%s878_s0 + $0xa0] sm:$0xff] }
  0x10   :  { %529 = vmatpush.msra.mxu2 %v317_v15  ;;  %530 = vmatpush.msrb.mxu3 %v317_v15  ;;  %v35_v35 = vld [vmem:[%s878_s0 + $0x70] sm:$0xff]  ;;  %v42_v36 = vld [vmem:[%s878_s0 + $0xa8] sm:$0xff]  ;;  %v36_v37 = vld [vmem:[%s878_s0 + $0x78] sm:$0xff] }
  0x11   :  { %329 = vmatpush.msra.mxu1 %v316_v16  ;;  %v43_v38 = vld [vmem:[%s878_s0 + $0xb0] sm:$0xff]  ;;  %v760_v39 = vld [vmem:[%s880_s2] ss:$0 sm:$0xff]  ;;  %v44_v44 = vld [vmem:[%s878_s0 + $0xb8] sm:$0xff] }
  0x12   :  { %531 = vmatpush.msra.mxu2 %v316_v16  ;;  %532 = vmatpush.msrb.mxu3 %v316_v16  ;;  %v37_v41 = vld [vmem:[%s878_s0 + $0x80] sm:$0xff]  ;;  %v38_v46 = vld [vmem:[%s878_s0 + $0x88] sm:$0xff]  ;;  %v47_v57 = vld [vmem:[%s878_s0 + $0xd0] sm:$0xff] }
  0x13   :  { %330 = vmatpush.msra.mxu1 %v315_v17  ;;  %v45_v49 = vld [vmem:[%s878_s0 + $0xc0] sm:$0xff]  ;;  %v46_v53 = vld [vmem:[%s878_s0 + $0xc8] sm:$0xff]  ;;  %v48_v61 = vld [vmem:[%s878_s0 + $0xd8] sm:$0xff] }
  0x14   :  { %533 = vmatpush.msra.mxu2 %v315_v17  ;;  %534 = vmatpush.msrb.mxu3 %v315_v17  ;;  %v49_v1 = vld [vmem:[%s878_s0 + $0xe0] sm:$0xff]  ;;  %v52_v13 = vld [vmem:[%s878_s0 + $0xf8] sm:$0xff] }
  0x15   :  { %491 = vmatmul.msk.f32.gmra.mxu0 %vm59_vm1, %v23_v4  ;;  %331 = vmatpush.msra.mxu1 %v314_v18 }
  0x16   :  { %535 = vmatpush.msra.mxu2 %v314_v18  ;;  %536 = vmatpush.msrb.mxu3 %v314_v18 }
  0x17   :  { %332 = vmatpush.msra.mxu1 %v313_v20  ;;  %508 = vmatmul.msk.f32.gmra.mxu3 %vm59_vm1, %v40_v32 }
  0x18   :  { %537 = vmatpush.msra.mxu2 %v313_v20  ;;  %538 = vmatpush.msrb.mxu3 %v313_v20 }
  0x19   :  { %333 = vmatpush.msra.mxu1 %v312_v21 }
  0x1a   :  { %539 = vmatpush.msra.mxu2 %v312_v21  ;;  %540 = vmatpush.msrb.mxu3 %v312_v21 }
  0x1b   :  { %334 = vmatpush.msra.mxu1 %v311_v22 }
  0x1c   :  { %541 = vmatpush.msra.mxu2 %v311_v22  ;;  %542 = vmatpush.msrb.mxu3 %v311_v22 }
  0x1d   :  { %492 = vmatmul.msk.f32.gmra.mxu0 %vm59_vm1, %v24_v5  ;;  %335 = vmatpush.msra.mxu1 %v310_v23  ;;  %v50_v5 = vld [vmem:[%s878_s0 + $0xe8] sm:$0xff] }
  0x1e   :  { %543 = vmatpush.msra.mxu2 %v310_v23  ;;  %544 = vmatpush.msrb.mxu3 %v310_v23 }
  0x1f   :  { %336 = vmatpush.msra.mxu1 %v309_v25  ;;  %509 = vmatmul.msk.f32.gmra.mxu3 %vm59_vm1, %v41_v34 }
  0x20   :  { %545 = vmatpush.msra.mxu2 %v309_v25  ;;  %546 = vmatpush.msrb.mxu3 %v309_v25 }
  0x21   :  { %337 = vmatpush.msra.mxu1 %v308_v27 }
  0x22   :  { %547 = vmatpush.msra.mxu2 %v308_v27  ;;  %548 = vmatpush.msrb.mxu3 %v308_v27 }
  0x23   :  { %338 = vmatpush.msra.mxu1 %v307_v28 }
  0x24   :  { %549 = vmatpush.msra.mxu2 %v307_v28  ;;  %550 = vmatpush.msrb.mxu3 %v307_v28 }
  0x25   :  { %493 = vmatmul.msk.f32.gmra.mxu0 %vm59_vm1, %v25_v6  ;;  %339 = vmatpush.msra.mxu1 %v306_v30 }
  0x26   :  { %551 = vmatpush.msra.mxu2 %v306_v30  ;;  %552 = vmatpush.msrb.mxu3 %v306_v30 }
  0x27   :  { %340 = vmatpush.msra.mxu1 %v305_v31  ;;  %510 = vmatmul.msk.f32.gmra.mxu3 %vm59_vm1, %v42_v36 }
  0x28   :  { %553 = vmatpush.msra.mxu2 %v305_v31  ;;  %554 = vmatpush.msrb.mxu3 %v305_v31 }
  0x2d   :  { %494 = vmatmul.msk.f32.gmra.mxu0 %vm59_vm1, %v26_v7 }
  0x2f   :  { %511 = vmatmul.msk.f32.gmra.mxu3 %vm59_vm1, %v43_v38 }
  0x35   :  { %495 = vmatmul.msk.f32.gmra.mxu0 %vm59_vm1, %v27_v8 }
  0x37   :  { %512 = vmatmul.msk.f32.gmra.mxu3 %vm59_vm1, %v44_v44 }
  0x3d   :  { %496 = vmatmul.msk.f32.gmra.mxu0 %vm59_vm1, %v28_v9  ;;  %v51_v9 = vld [vmem:[%s878_s0 + $0xf0] sm:$0xff] }
  0x3f   :  { %513 = vmatmul.msk.f32.gmra.mxu3 %vm59_vm1, %v45_v49 }
  0x45   :  { %497 = vmatmul.msk.f32.gmra.mxu0 %vm59_vm1, %v29_v10 }
  0x47   :  { %514 = vmatmul.msk.f32.gmra.mxu3 %vm59_vm1, %v46_v53 }
  0x4d   :  { %498 = vmatmul.msk.f32.gmra.mxu0 %vm59_vm1, %v30_v14 }
  0x4f   :  { %515 = vmatmul.msk.f32.gmra.mxu3 %vm59_vm1, %v47_v57 }
  0x55   :  { %499 = vmatmul.msk.f32.gmra.mxu0 %vm59_vm1, %v31_v19 }
  0x57   :  { %516 = vmatmul.msk.f32.gmra.mxu3 %vm59_vm1, %v48_v61 }
  0x5d   :  { %500 = vmatmul.msk.f32.gmra.mxu0 %vm59_vm1, %v32_v24 }
  0x5f   :  { %517 = vmatmul.msk.f32.gmra.mxu3 %vm59_vm1, %v49_v1 }
  0x65   :  { %501 = vmatmul.msk.f32.gmra.mxu0 %vm59_vm1, %v33_v29 }
  0x67   :  { %518 = vmatmul.msk.f32.gmra.mxu3 %vm59_vm1, %v50_v5 }
  0x6d   :  { %502 = vmatmul.msk.f32.gmra.mxu0 %vm59_vm1, %v34_v33 }
  0x6f   :  { %519 = vmatmul.msk.f32.gmra.mxu3 %vm59_vm1, %v51_v9 }
  0x75   :  { %503 = vmatmul.msk.f32.gmra.mxu0 %vm59_vm1, %v35_v35 }
  0x77   :  { %520 = vmatmul.msk.f32.gmra.mxu3 %vm59_vm1, %v52_v13 }
  0x7d   :  { %504 = vmatmul.msk.f32.gmra.mxu0 %vm59_vm1, %v36_v37 }
  0x82   :  { %v177_v40 = vpop.f32.mrf.mxu0 }
  0x83   :  { %v178_v42 = vadd.f32 %v760_v39, %v177_v40  ;;  %v825_v40 = vld [vmem:[%s882_s4] ss:$0 sm:$0xff]  ;;  %s586_s4 = smov [#allocation2]  }
  0x84   :  { %s474_s14 = sshll.u32 %s586_s4, 4  ;;  %s475_s14 = int_to_ptr.vmem [resolvable:$true] %s474_s14 }
  0x85   :  { %v273_v43 = vmax.f32 %v178_v42, 0.0  ;;  %505 = vmatmul.msk.f32.gmra.mxu0 %vm59_vm1, %v37_v41 }
  0x87   :  { %341 = vmatmul.f32.vlgmr.msra.gmra.mxu1 %v273_v43 }
  0x8a   :  { %v180_v45 = vpop.f32.mrf.mxu0 }
  0x8b   :  { %v181_v47 = vadd.f32 %v760_v39, %v180_v45 }
  0x8d   :  { %v274_v48 = vmax.f32 %v181_v47, 0.0  ;;  %506 = vmatmul.msk.f32.gmra.mxu0 %vm59_vm1, %v38_v46 }
  0x8f   :  { %344 = vmatmul.f32.gmra.mxu1 %v274_v48 }
  0x92   :  { %v183_v50 = vpop.f32.mrf.mxu0  ;;  %v231_v24 = vpop.f32.mrf.mxu3 }
  0x93   :  { %v184_v51 = vadd.f32 %v760_v39, %v183_v50  ;;  %v232_v53 = vadd.f32 %v760_v39, %v231_v24 }
  0x95   :  { %v275_v52 = vmax.f32 %v184_v51, 0.0 }
  0x97   :  { %347 = vmatmul.f32.gmra.mxu1 %v275_v52 }
  0x9a   :  { %v186_v54 = vpop.f32.mrf.mxu0  ;;  %v234_v28 = vpop.f32.mrf.mxu3 }
  0x9b   :  { %v187_v55 = vadd.f32 %v760_v39, %v186_v54 }
  0x9d   :  { %v276_v56 = vmax.f32 %v187_v55, 0.0 }
  0x9f   :  { %350 = vmatmul.f32.gmra.mxu1 %v276_v56  ;;  %v291_v56 = vmax.f32 %v232_v53, 0.0 }
  0xa2   :  { %v189_v58 = vpop.f32.mrf.mxu0  ;;  %v237_v32 = vpop.f32.mrf.mxu3 }
  0xa3   :  { %v190_v59 = vadd.f32 %v760_v39, %v189_v58  ;;  %v235_v58 = vadd.f32 %v760_v39, %v234_v28 }
  0xa5   :  { %v277_v60 = vmax.f32 %v190_v59, 0.0  ;;  %v292_v61 = vmax.f32 %v235_v58, 0.0 }
  0xa7   :  { %353 = vmatmul.f32.gmra.mxu1 %v277_v60 }
  0xaa   :  { %v192_v62 = vpop.f32.mrf.mxu0  ;;  %v240_v36 = vpop.f32.mrf.mxu3 }
  0xab   :  { %v193_v63 = vadd.f32 %v760_v39, %v192_v62 }
  0xad   :  { %v278_v0 = vmax.f32 %v193_v63, 0.0  ;;  %v238_v63 = vadd.f32 %v760_v39, %v237_v32 }
  0xaf   :  { %356 = vmatmul.f32.gmra.mxu1 %v278_v0 }
  0xb2   :  { %v195_v2 = vpop.f32.mrf.mxu0  ;;  %v243_v42 = vpop.f32.mrf.mxu3 }
  0xb3   :  { %v196_v3 = vadd.f32 %v760_v39, %v195_v2  ;;  %v293_v2 = vmax.f32 %v238_v63, 0.0  ;;  %v244_v9 = vadd.f32 %v760_v39, %v243_v42 }
  0xb5   :  { %v279_v4 = vmax.f32 %v196_v3, 0.0 }
  0xb7   :  { %359 = vmatmul.f32.gmra.mxu1 %v279_v4  ;;  %v241_v4 = vadd.f32 %v760_v39, %v240_v36 }
  0xba   :  { %v198_v6 = vpop.f32.mrf.mxu0  ;;  %v246_v48 = vpop.f32.mrf.mxu3 }
  0xbb   :  { %v199_v7 = vadd.f32 %v760_v39, %v198_v6 }
  0xbd   :  { %v280_v8 = vmax.f32 %v199_v7, 0.0  ;;  %v294_v7 = vmax.f32 %v241_v4, 0.0 }
  0xbf   :  { %362 = vmatmul.f32.gmra.mxu1 %v280_v8 }
  0xc2   :  { %v201_v10 = vpop.f32.mrf.mxu0  ;;  %v249_v54 = vpop.f32.mrf.mxu3 }
  0xc3   :  { %v202_v11 = vadd.f32 %v760_v39, %v201_v10 }
  0xc5   :  { %v281_v12 = vmax.f32 %v202_v11, 0.0 }
  0xc7   :  { %365 = vmatmul.f32.gmra.mxu1 %v281_v12  ;;  %v295_v12 = vmax.f32 %v244_v9, 0.0 }
  0xca   :  { %v204_v14 = vpop.f32.mrf.mxu0  ;;  %v252_v59 = vpop.f32.mrf.mxu3 }
  0xcb   :  { %v205_v15 = vadd.f32 %v760_v39, %v204_v14  ;;  %v247_v14 = vadd.f32 %v760_v39, %v246_v48 }
  0xcd   :  { %v282_v16 = vmax.f32 %v205_v15, 0.0 }
  0xcf   :  { %368 = vmatmul.f32.gmra.mxu1 %v282_v16 }
  0xd2   :  { %v207_v17 = vpop.f32.mrf.mxu0  ;;  %v255_v0 = vpop.f32.mrf.mxu3 }
  0xd3   :  { %v208_v18 = vadd.f32 %v760_v39, %v207_v17  ;;  %v296_v17 = vmax.f32 %v247_v14, 0.0 }
  0xd5   :  { %v283_v19 = vmax.f32 %v208_v18, 0.0 }
  0xd7   :  { %371 = vmatmul.f32.gmra.mxu1 %v283_v19  ;;  %v250_v19 = vadd.f32 %v760_v39, %v249_v54 }
  0xda   :  { %v210_v20 = vpop.f32.mrf.mxu0  ;;  %v258_v5 = vpop.f32.mrf.mxu3 }
  0xdb   :  { %v211_v21 = vadd.f32 %v760_v39, %v210_v20 }
  0xdd   :  { %v284_v22 = vmax.f32 %v211_v21, 0.0 }
  0xdf   :  { %374 = vmatmul.f32.gmra.mxu1 %v284_v22 }
  0xe2   :  { %v213_v23 = vpop.f32.mrf.mxu0  ;;  %v261_v10 = vpop.f32.mrf.mxu3 }
  0xe3   :  { %v214_v25 = vadd.f32 %v760_v39, %v213_v23  ;;  %v297_v23 = vmax.f32 %v250_v19, 0.0 }
  0xe5   :  { %v285_v26 = vmax.f32 %v214_v25, 0.0 }
  0xe7   :  { %377 = vmatmul.f32.gmra.mxu1 %v285_v26  ;;  %v253_v26 = vadd.f32 %v760_v39, %v252_v59 }
  0xea   :  { %v216_v27 = vpop.f32.mrf.mxu0  ;;  %v264_v15 = vpop.f32.mrf.mxu3 }
  0xeb   :  { %v217_v29 = vadd.f32 %v760_v39, %v216_v27 }
  0xed   :  { %v286_v30 = vmax.f32 %v217_v29, 0.0 }
  0xef   :  { %380 = vmatmul.f32.gmra.mxu1 %v286_v30  ;;  %v298_v30 = vmax.f32 %v253_v26, 0.0 }
  0xf2   :  { %v219_v31 = vpop.f32.mrf.mxu0  ;;  %v267_v20 = vpop.f32.mrf.mxu3 }
  0xf3   :  { %v220_v33 = vadd.f32 %v760_v39, %v219_v31  ;;  %v268_v21 = vadd.f32 %v760_v39, %v267_v20 }
  0xf5   :  { %v287_v34 = vmax.f32 %v220_v33, 0.0  ;;  %v303_v25 = vmax.f32 %v268_v21, 0.0  ;;  %v256_v33 = vadd.f32 %v760_v39, %v255_v0 }
  0xf7   :  { %383 = vmatmul.f32.gmra.mxu1 %v287_v34  ;;  %431 = vmatmul.f32.vlgmr.msrb.gmra.mxu3 %v303_v25 }
  0xfa   :  { %v222_v35 = vpop.f32.mrf.mxu0  ;;  %v270_v27 = vpop.f32.mrf.mxu3 }
  0xfb   :  { %v223_v37 = vadd.f32 %v760_v39, %v222_v35  ;;  %v271_v28 = vadd.f32 %v760_v39, %v270_v27  ;;  %v299_v35 = vmax.f32 %v256_v33, 0.0 }
  0xfd   :  { %v288_v38 = vmax.f32 %v223_v37, 0.0  ;;  %v304_v32 = vmax.f32 %v271_v28, 0.0  ;;  %v259_v37 = vadd.f32 %v760_v39, %v258_v5 }
  0xff   :  { %386 = vmatmul.f32.vlgmr.msra.gmra.mxu2 %v288_v38  ;;  %434 = vmatmul.f32.gmra.mxu3 %v304_v32 }
 0x102   :  { %v225_v41 = vpop.f32.mrf.mxu0 }
 0x103   :  { %v226_v43 = vadd.f32 %v760_v39, %v225_v41  ;;  %v300_v41 = vmax.f32 %v259_v37, 0.0 }
 0x104   :  { %v342_v44 = vpop.f32.mrf.mxu1 }
 0x105   :  { %v289_v45 = vmax.f32 %v226_v43, 0.0  ;;  %v343_v46 = vadd.f32 %v825_v40, %v342_v44  ;;  %v262_v43 = vadd.f32 %v760_v39, %v261_v10 }
 0x107   :  { %438 = vst [vmem:[#allocation2] sm:$0xff] %v343_v46  ;;  %389 = vmatmul.f32.gmra.mxu2 %v289_v45  ;;  %v301_v45 = vmax.f32 %v262_v43, 0.0 }
 0x10a   :  { %v228_v47 = vpop.f32.mrf.mxu0 }
 0x10b   :  { %v229_v49 = vadd.f32 %v760_v39, %v228_v47  ;;  %v265_v47 = vadd.f32 %v760_v39, %v264_v15 }
 0x10c   :  { %v345_v50 = vpop.f32.mrf.mxu1 }
 0x10d   :  { %v290_v51 = vmax.f32 %v229_v49, 0.0  ;;  %v346_v52 = vadd.f32 %v825_v40, %v345_v50  ;;  %v302_v49 = vmax.f32 %v265_v47, 0.0 }
 0x10f   :  { %439 = vst [vmem:[#allocation2 + $0x8] sm:$0xff] %v346_v52  ;;  %392 = vmatmul.f32.gmra.mxu2 %v290_v51 }
 0x114   :  { %v348_v55 = vpop.f32.mrf.mxu1 }
 0x115   :  { %v349_v57 = vadd.f32 %v825_v40, %v348_v55 }
 0x117   :  { %440 = vst [vmem:[#allocation2 + $0x10] sm:$0xff] %v349_v57  ;;  %395 = vmatmul.f32.gmra.mxu2 %v291_v56 }
 0x11c   :  { %v351_v60 = vpop.f32.mrf.mxu1 }
 0x11d   :  { %v352_v62 = vadd.f32 %v825_v40, %v351_v60 }
 0x11f   :  { %441 = vst [vmem:[#allocation2 + $0x18] sm:$0xff] %v352_v62  ;;  %398 = vmatmul.f32.gmra.mxu2 %v292_v61 }
 0x124   :  { %v354_v1 = vpop.f32.mrf.mxu1 }
 0x125   :  { %v355_v3 = vadd.f32 %v825_v40, %v354_v1 }
 0x127   :  { %442 = vst [vmem:[#allocation2 + $0x20] sm:$0xff] %v355_v3  ;;  %401 = vmatmul.f32.gmra.mxu2 %v293_v2 }
 0x12c   :  { %v357_v6 = vpop.f32.mrf.mxu1 }
 0x12d   :  { %v358_v8 = vadd.f32 %v825_v40, %v357_v6 }
 0x12f   :  { %443 = vst [vmem:[#allocation2 + $0x28] sm:$0xff] %v358_v8  ;;  %404 = vmatmul.f32.gmra.mxu2 %v294_v7 }
 0x134   :  { %v360_v11 = vpop.f32.mrf.mxu1 }
 0x135   :  { %v361_v13 = vadd.f32 %v825_v40, %v360_v11 }
 0x137   :  { %444 = vst [vmem:[#allocation2 + $0x30] sm:$0xff] %v361_v13  ;;  %407 = vmatmul.f32.gmra.mxu2 %v295_v12 }
 0x13c   :  { %v363_v16 = vpop.f32.mrf.mxu1 }
 0x13d   :  { %v364_v18 = vadd.f32 %v825_v40, %v363_v16 }
 0x13f   :  { %445 = vst [vmem:[#allocation2 + $0x38] sm:$0xff] %v364_v18  ;;  %410 = vmatmul.f32.gmra.mxu2 %v296_v17 }
 0x144   :  { %v366_v22 = vpop.f32.mrf.mxu1 }
 0x145   :  { %v367_v24 = vadd.f32 %v825_v40, %v366_v22 }
 0x147   :  { %446 = vst [vmem:[#allocation2 + $0x40] sm:$0xff] %v367_v24  ;;  %413 = vmatmul.f32.gmra.mxu2 %v297_v23 }
 0x14c   :  { %v369_v29 = vpop.f32.mrf.mxu1 }
 0x14d   :  { %v370_v31 = vadd.f32 %v825_v40, %v369_v29 }
 0x14f   :  { %447 = vst [vmem:[#allocation2 + $0x48] sm:$0xff] %v370_v31  ;;  %416 = vmatmul.f32.gmra.mxu2 %v298_v30 }
 0x154   :  { %v372_v34 = vpop.f32.mrf.mxu1 }
 0x155   :  { %v373_v36 = vadd.f32 %v825_v40, %v372_v34 }
 0x157   :  { %448 = vst [vmem:[#allocation2 + $0x50] sm:$0xff] %v373_v36  ;;  %419 = vmatmul.f32.gmra.mxu2 %v299_v35 }
 0x15c   :  { %v375_v38 = vpop.f32.mrf.mxu1 }
 0x15d   :  { %v376_v42 = vadd.f32 %v825_v40, %v375_v38 }
 0x15f   :  { %449 = vst [vmem:[#allocation2 + $0x58] sm:$0xff] %v376_v42  ;;  %422 = vmatmul.f32.gmra.mxu2 %v300_v41 }
 0x164   :  { %v378_v44 = vpop.f32.mrf.mxu1 }
 0x165   :  { %v379_v46 = vadd.f32 %v825_v40, %v378_v44 }
 0x167   :  { %450 = vst [vmem:[#allocation2 + $0x60] sm:$0xff] %v379_v46  ;;  %425 = vmatmul.f32.gmra.mxu2 %v301_v45 }
 0x16c   :  { %v381_v48 = vpop.f32.mrf.mxu1 }
 0x16d   :  { %v382_v50 = vadd.f32 %v825_v40, %v381_v48 }
 0x16f   :  { %451 = vst [vmem:[#allocation2 + $0x68] sm:$0xff] %v382_v50  ;;  %428 = vmatmul.f32.gmra.mxu2 %v302_v49 }
 0x174   :  { %v384_v51 = vpop.f32.mrf.mxu1 }
 0x175   :  { %v385_v52 = vadd.f32 %v825_v40, %v384_v51 }
 0x177   :  { %452 = vst [vmem:[#allocation2 + $0x70] sm:$0xff] %v385_v52 }
 0x17a   :  { %v432_v7 = vpop.f32.mrf.mxu3 }
 0x17b   :  { %v433_v9 = vadd.f32 %v825_v40, %v432_v7 }
 0x17d   :  { %468 = vst [vmem:[#allocation2 + $0xf0] sm:$0xff] %v433_v9 }
 0x182   :  { %v387_v53 = vpop.f32.mrf.mxu2  ;;  %v435_v11 = vpop.f32.mrf.mxu3 }
 0x183   :  { %v388_v54 = vadd.f32 %v825_v40, %v387_v53  ;;  %v436_v13 = vadd.f32 %v825_v40, %v435_v11 }
 0x185   :  { %453 = vst [vmem:[#allocation2 + $0x78] sm:$0xff] %v388_v54 }
 0x186   :  { %469 = vst [vmem:[#allocation2 + $0xf8] sm:$0xff] %v436_v13 }
 0x18a   :  { %v390_v55 = vpop.f32.mrf.mxu2 }
 0x18b   :  { %v391_v56 = vadd.f32 %v825_v40, %v390_v55 }
 0x18d   :  { %454 = vst [vmem:[#allocation2 + $0x80] sm:$0xff] %v391_v56 }
 0x192   :  { %v393_v57 = vpop.f32.mrf.mxu2 }
 0x193   :  { %v394_v39 = vadd.f32 %v825_v40, %v393_v57 }
 0x195   :  { %455 = vst [vmem:[#allocation2 + $0x88] sm:$0xff] %v394_v39 }
 0x19a   :  { %v396_v58 = vpop.f32.mrf.mxu2 }
 0x19b   :  { %v397_v59 = vadd.f32 %v825_v40, %v396_v58 }
 0x19d   :  { %456 = vst [vmem:[#allocation2 + $0x90] sm:$0xff] %v397_v59 }
 0x1a2   :  { %v399_v60 = vpop.f32.mrf.mxu2 }
 0x1a3   :  { %v400_v61 = vadd.f32 %v825_v40, %v399_v60 }
 0x1a5   :  { %457 = vst [vmem:[#allocation2 + $0x98] sm:$0xff] %v400_v61 }
 0x1aa   :  { %v402_v62 = vpop.f32.mrf.mxu2 }
 0x1ab   :  { %v403_v63 = vadd.f32 %v825_v40, %v402_v62 }
 0x1ad   :  { %458 = vst [vmem:[#allocation2 + $0xa0] sm:$0xff] %v403_v63 }
 0x1b2   :  { %v405_v0 = vpop.f32.mrf.mxu2 }
 0x1b3   :  { %v406_v1 = vadd.f32 %v825_v40, %v405_v0 }
 0x1b5   :  { %459 = vst [vmem:[#allocation2 + $0xa8] sm:$0xff] %v406_v1 }
 0x1ba   :  { %v408_v2 = vpop.f32.mrf.mxu2 }
 0x1bb   :  { %v409_v3 = vadd.f32 %v825_v40, %v408_v2 }
 0x1bd   :  { %460 = vst [vmem:[#allocation2 + $0xb0] sm:$0xff] %v409_v3 }
 0x1c2   :  { %v411_v4 = vpop.f32.mrf.mxu2 }
 0x1c3   :  { %v412_v5 = vadd.f32 %v825_v40, %v411_v4 }
 0x1c5   :  { %461 = vst [vmem:[#allocation2 + $0xb8] sm:$0xff] %v412_v5 }
 0x1ca   :  { %v414_v6 = vpop.f32.mrf.mxu2 }
 0x1cb   :  { %v415_v8 = vadd.f32 %v825_v40, %v414_v6 }
 0x1cd   :  { %462 = vst [vmem:[#allocation2 + $0xc0] sm:$0xff] %v415_v8 }
 0x1d2   :  { %v417_v10 = vpop.f32.mrf.mxu2 }
 0x1d3   :  { %v418_v12 = vadd.f32 %v825_v40, %v417_v10 }
 0x1d5   :  { %463 = vst [vmem:[#allocation2 + $0xc8] sm:$0xff] %v418_v12 }
 0x1da   :  { %v420_v14 = vpop.f32.mrf.mxu2 }
 0x1db   :  { %v421_v15 = vadd.f32 %v825_v40, %v420_v14 }
 0x1dd   :  { %464 = vst [vmem:[#allocation2 + $0xd0] sm:$0xff] %v421_v15 }
 0x1e2   :  { %v423_v16 = vpop.f32.mrf.mxu2 }
 0x1e3   :  { %v424_v17 = vadd.f32 %v825_v40, %v423_v16 }
 0x1e5   :  { %465 = vst [vmem:[#allocation2 + $0xd8] sm:$0xff] %v424_v17 }
 0x1ea   :  { %v426_v18 = vpop.f32.mrf.mxu2 }
 0x1eb   :  { %v427_v19 = vadd.f32 %v825_v40, %v426_v18 }
 0x1ed   :  { %466 = vst [vmem:[#allocation2 + $0xe0] sm:$0xff] %v427_v19 }
 0x1f2   :  { %v429_v20 = vpop.f32.mrf.mxu2 }
 0x1f3   :  { %v430_v21 = vadd.f32 %v825_v40, %v429_v20 }
 0x1f5   :  { %467 = vst [vmem:[#allocation2 + $0xe8] sm:$0xff] %v430_v21 }
 0x1f6   :  { %482 = dma.vmem_to_hbm [thread:$0]  %s475_s14, 4096, %s477_s17, [#allocation3], %s587_s18, %s587_s18, %s588_s19  }
 0x1f7   :  { %584 = dma.done.wait [#allocation3], 4096  }
 0x1f8   :  { %585 = vsyncadd [#allocation3], 4294963200 }
 0x1f9   :  { %487 = vsyncpa [#allocation3], 1 }

</bundles_post_ra>
